<compile_context>
chip_gen: v7x
topology: tpu7x:2x2x1
jax: 0.10.0
libtpu: 0.0.40
codegen_flags: <defaults>
</compile_context>

<pallas_src>
import functools

import jax
import jax.numpy as jnp
import numpy as np
from jax.experimental import pallas as pl
from jax.experimental.pallas import tpu as pltpu


def _style_components_kernel(num_heads,
                             comp_ref, refs_ref,
                             wq_ref, wk_ref, wv_ref, wfcr_ref,
                             gamma_ref, beta_ref,
                             out_ref,
                             q_scr, m_scr, l_scr, acc_scr):
    _, n, c = comp_ref.shape            # (1, N, C)
    hw_t = refs_ref.shape[-1]           # spatial tile width
    m = num_heads
    d = c // m
    cdt = refs_ref.dtype                # MXU operand dtype (bf16-friendly; no f32 upcast)

    k_idx = pl.program_id(1)
    s_idx = pl.program_id(2)
    is_first = jnp.logical_and(k_idx == 0, s_idx == 0)
    is_last = jnp.logical_and(k_idx == pl.num_programs(1) - 1,
                              s_idx == pl.num_programs(2) - 1)

    # ---------------- init: flash state + query projection (once per batch element) --------
    @pl.when(is_first)
    def _init():
        m_scr[...] = jnp.full_like(m_scr, -jnp.inf)
        l_scr[...] = jnp.zeros_like(l_scr)
        acc_scr[...] = jnp.zeros_like(acc_scr)
        comp = comp_ref[0]                                               # (N, C)
        # Head h uses rows [h*d, (h+1)*d) of the PyTorch-layout (C_out, C_in) weight -- a
        # SUBLANE slice (no lane shuffles).  Runs once per batch element, so these m tiny
        # matmuls are negligible; the steady-state loop below is fully head-batched.
        for h in range(m):
            wq_h = wq_ref[h * d:(h + 1) * d, :]                          # (d, C)
            q_h = jax.lax.dot_general(comp, wq_h, (((1,), (1,)), ((), ())),
                                      preferred_element_type=jnp.float32)   # (N, d)
            q_scr[h, :, :] = q_h.astype(q_scr.dtype)

    # ---------------- K/V projection for this reference tile (channels-first, NCHW-native) --
    refs = refs_ref[0, 0]                                                # (C, hw_t)
    # kT/vT land directly in the per-head (d, s) layout the scores matmul wants.
    kT = jnp.dot(wk_ref[...], refs, preferred_element_type=jnp.float32).astype(cdt)  # (C, hw_t)
    vT = jnp.dot(wv_ref[...], refs, preferred_element_type=jnp.float32).astype(cdt)
    kTh = kT.reshape(m, d, hw_t)    # sublane-only head split (d should be a multiple of 8)
    vTh = vT.reshape(m, d, hw_t)

    # ---------------- head-batched scores + online softmax over the reference axis ----------
    q = q_scr[...]                                                       # (m, N, d)
    s_blk = jnp.einsum('hnd,hds->hns', q, kTh,
                       preferred_element_type=jnp.float32)               # (m, N, hw_t)
    # (No 1/sqrt(d) score scale -- matches the PyTorch module.)
    m_prev = m_scr[...]                                                  # (m, N)
    m_new = jnp.maximum(m_prev, jnp.max(s_blk, axis=-1))
    alpha = jnp.exp(m_prev - m_new)
    p = jnp.exp(s_blk - m_new[..., None])                                # (m, N, hw_t)
    l_scr[...] = alpha * l_scr[...] + jnp.sum(p, axis=-1)
    pv = jnp.einsum('hns,hjs->hnj', p.astype(cdt), vTh,
                    preferred_element_type=jnp.float32)                  # (m, N, d)
    acc_scr[...] = alpha[..., None] * acc_scr[...] + pv
    m_scr[...] = m_new

    # ---------------- epilogue: heads -> channels, output FC, residual + LayerNorm ----------
    @pl.when(is_last)
    def _epilogue():
        o = acc_scr[...] / l_scr[...][..., None]                         # (m, N, d) f32, exact div
        # concat_h(o_h) @ Wfc^T  ==  sum_h  o_h @ Wfc_r[h]  with Wfc_r = Wfc^T as (m, d, C):
        # one batched matmul + a leading-axis sum instead of per-head lane concatenation.
        o_fc = jnp.einsum('hnj,hjo->hno', o.astype(cdt), wfcr_ref[...],
                          preferred_element_type=jnp.float32)            # (m, N, C)
        x = jnp.sum(o_fc, axis=0) + comp_ref[0].astype(jnp.float32)      # (N, C)
        mean = jnp.mean(x, axis=-1, keepdims=True)
        var = jnp.mean((x - mean) * (x - mean), axis=-1, keepdims=True)
        y = (x - mean) * jax.lax.rsqrt(var + 1e-6)
        y = y * gamma_ref[...].astype(jnp.float32) + beta_ref[...].astype(jnp.float32)
        out_ref[0] = y.astype(out_ref.dtype)


def _vmem_limit_bytes():
    """Generation-aware VMEM budget: ~3/4 of physical, capped (v7x: 64 MiB/TC, v5e/v6e: 128)."""
    try:
        cap = pltpu.get_tpu_info().vmem_capacity_bytes
    except Exception:
        cap = 64 * 1024 * 1024
    return int(min(cap * 3 // 4, 100 * 1024 * 1024))


def _default_block_hw(HW, C, itemsize, vmem_budget):
    """Largest spatial tile (divisor of HW; multiple of 128 or the full HW) whose streamed refs
    tile plus its f32 K^T/V^T temporaries stay within ~1/4 of the VMEM budget."""
    per_col = C * (2 * itemsize            # refs tile, double-buffered
                   + 2 * 4 + 2 * itemsize)  # f32 kT/vT + operand-dtype copies
    cap = max(128, (vmem_budget // 4) // max(per_col, 1))
    if HW <= cap:
        return HW
    t = cap - cap % 128
    while t >= 128:
        if HW % t == 0:
            return t
        t -= 128
    return HW   # no 128-multiple divisor of HW: fall back to the full (unblocked) extent


def get_style_components(component_sequence, reference_map_list,
                         wq, wk, wv, wfc, gamma, beta, num_heads,
                         *, block_hw=None):
    """component_sequence: (B, N, C); reference_map_list: (B, K, C, H, W) (NCHW).
    Weights are in PyTorch nn.Linear layout (C_out, C_in)."""
    B, N, C = component_sequence.shape
    _, K, Cr, H, W = reference_map_list.shape
    assert Cr == C and C % num_heads == 0
    m = num_heads
    d = C // m
    HW = H * W

    # NCHW consumed directly: pure metadata reshape (contiguous), no HBM pass.
    refs = reference_map_list.reshape(B, K, C, HW)

    vmem_budget = _vmem_limit_bytes()
    if block_hw is None:
        block_hw = _default_block_hw(HW, C, reference_map_list.dtype.itemsize, vmem_budget)
    assert HW % block_hw == 0
    n_hw = HW // block_hw

    # Tiny host-side rearrangement of the concat-fc weight: (C_out, C_in) -> (m, d, C_out).
    wfc_r = jnp.transpose(wfc).reshape(m, d, C)
    gamma2 = gamma.reshape(1, C)
    beta2 = beta.reshape(1, C)

    kernel = functools.partial(_style_components_kernel, m)

    # TODO(synk): mark the weight/gamma/beta specs pipeline_mode=pl.Buffered(1) (constant index
    # maps never re-fetch) and Buffered(3) on the refs spec for v5e once verified on-target.
    # TODO(synk): when B == 1 on v7x, split the reference (reduction) axis across the two
    # TensorCores (per-core partial flash state + combine) so the second core is not idle.
    return pl.pallas_call(
        kernel,
        out_shape=jax.ShapeDtypeStruct((B, N, C), component_sequence.dtype),
        grid_spec=pltpu.PrefetchScalarGridSpec(
            num_scalar_prefetch=0,
            grid=(B, K, n_hw),
            in_specs=[
                pl.BlockSpec((1, N, C), lambda b, k, s: (b, 0, 0)),               # components
                pl.BlockSpec((1, 1, C, block_hw), lambda b, k, s: (b, k, 0, s)),  # reference maps
                pl.BlockSpec((C, C), lambda b, k, s: (0, 0)),                     # Wq (out, in)
                pl.BlockSpec((C, C), lambda b, k, s: (0, 0)),                     # Wk (out, in)
                pl.BlockSpec((C, C), lambda b, k, s: (0, 0)),                     # Wv (out, in)
                pl.BlockSpec((m, d, C), lambda b, k, s: (0, 0, 0)),               # Wfc^T as (m,d,C)
                pl.BlockSpec((1, C), lambda b, k, s: (0, 0)),                     # LN gamma
                pl.BlockSpec((1, C), lambda b, k, s: (0, 0)),                     # LN beta
            ],
            out_specs=pl.BlockSpec((1, N, C), lambda b, k, s: (b, 0, 0)),
            scratch_shapes=[
                pltpu.VMEM((m, N, d), component_sequence.dtype),   # per-head queries
                pltpu.VMEM((m, N), jnp.float32),                   # running max
                pltpu.VMEM((m, N), jnp.float32),                   # running denom
                pltpu.VMEM((m, N, d), jnp.float32),                # output accumulator
            ]),
        compiler_params=pltpu.CompilerParams(
            dimension_semantics=("parallel", "arbitrary", "arbitrary"),
            vmem_limit_bytes=vmem_budget),
    )(component_sequence, refs, wq, wk, wv, wfc_r, gamma2, beta2)


def _reference_jax(component_sequence, reference_map_list,
                   wq, wk, wv, wfc, gamma, beta, num_heads):
    """Pure-JAX reference reproducing the PyTorch forward (weights in (out, in) layout)."""
    B, N, C = component_sequence.shape
    _, K, _, H, W = reference_map_list.shape
    m = num_heads
    d = C // m
    ref_seq = jnp.transpose(reference_map_list, (0, 1, 3, 4, 2)).reshape(B, K * H * W, C)
    key = (ref_seq @ wk.T).reshape(B, -1, m, d).transpose(0, 2, 1, 3)            # (B,m,S,d)
    val = (ref_seq @ wv.T).reshape(B, -1, m, d).transpose(0, 2, 1, 3)            # (B,m,S,d)
    qry = (component_sequence @ wq.T).reshape(B, N, m, d).transpose(0, 2, 3, 1)  # (B,m,d,N)
    scores = jnp.einsum('bmsd,bmdn->bmsn', key, qry).transpose(0, 1, 3, 2)       # (B,m,N,S)
    p = jax.nn.softmax(scores, axis=-1)
    out = jnp.einsum('bmns,bmsd->bmnd', p, val)
    out = out.transpose(0, 2, 1, 3).reshape(B, N, C)                             # 'b m n d -> b n (m d)'
    out = out @ wfc.T
    x = out + component_sequence
    mean = jnp.mean(x, axis=-1, keepdims=True)
    var = jnp.mean((x - mean) ** 2, axis=-1, keepdims=True)
    return (x - mean) / jnp.sqrt(var + 1e-6) * gamma + beta


if __name__ == "__main__":
    key = jax.random.PRNGKey(0)
    ks = jax.random.split(key, 8)

    # Small shapes consistent with the module: B=2, K=2 refs, C=32 channels, 4x4 maps,
    # N=8 components, 4 heads (d=8).
    B, K, C, H, W, N, num_heads = 2, 2, 32, 4, 4, 8, 4
    bound = 1.0 / np.sqrt(C)
    wq = jax.random.uniform(ks[0], (C, C), jnp.float32, -bound, bound)   # PyTorch (out, in)
    wk = jax.random.uniform(ks[1], (C, C), jnp.float32, -bound, bound)
    wv = jax.random.uniform(ks[2], (C, C), jnp.float32, -bound, bound)
    wfc = jax.random.uniform(ks[3], (C, C), jnp.float32, -bound, bound)
    gamma = jnp.ones((C,), jnp.float32)
    beta = jnp.zeros((C,), jnp.float32)
    comp = jax.random.normal(ks[4], (B, N, C), jnp.float32)
    refs = jax.random.normal(ks[5], (B, K, C, H, W), jnp.float32)

    ref_out = jax.block_until_ready(_reference_jax(
        comp, refs, wq, wk, wv, wfc, gamma, beta, num_heads))

    # Config 1: f32, default tiling (full 4x4 tile; the K=2 axis exercises the online softmax).
    out_f32 = jax.block_until_ready(get_style_components(
        comp, refs, wq, wk, wv, wfc, gamma, beta, num_heads))
    np.testing.assert_allclose(np.asarray(out_f32), np.asarray(ref_out), rtol=2e-2, atol=2e-2)

    # Config 2: bf16 operands (MXU-native), same shapes.
    bf = jnp.bfloat16
    out_bf16 = jax.block_until_ready(get_style_components(
        comp.astype(bf), refs.astype(bf), wq.astype(bf), wk.astype(bf), wv.astype(bf),
        wfc.astype(bf), gamma.astype(bf), beta.astype(bf), num_heads))
    np.testing.assert_allclose(np.asarray(out_bf16.astype(jnp.float32)), np.asarray(ref_out),
                               rtol=1e-1, atol=1e-1)

    # Config 3: 16x16 maps with an explicit 128-wide spatial tile -> also exercises the flash
    # reduction over the hw grid axis (2 lane-aligned tiles).
    B3, K3, H3, W3 = 1, 1, 16, 16
    comp3 = jax.random.normal(ks[6], (B3, N, C), jnp.float32)
    refs3 = jax.random.normal(ks[7], (B3, K3, C, H3, W3), jnp.float32)
    ref_out3 = jax.block_until_ready(_reference_jax(
        comp3, refs3, wq, wk, wv, wfc, gamma, beta, num_heads))
    out3 = jax.block_until_ready(get_style_components(
        comp3, refs3, wq, wk, wv, wfc, gamma, beta, num_heads, block_hw=128))
    np.testing.assert_allclose(np.asarray(out3), np.asarray(ref_out3), rtol=2e-2, atol=2e-2)

    print("KERNEL_OK")
</pallas_src>

<mosaic_0001>
module attributes {stable_mosaic.version = 11 : i64} {
  func.func @_style_components_kernel(%arg0: i32, %arg1: i32, %arg2: i32, %arg3: memref<1x8x32xf32, #tpu.memory_space<vmem>>, %arg4: memref<1x1x32x16xf32, #tpu.memory_space<vmem>>, %arg5: memref<32x32xf32, #tpu.memory_space<vmem>>, %arg6: memref<32x32xf32, #tpu.memory_space<vmem>>, %arg7: memref<32x32xf32, #tpu.memory_space<vmem>>, %arg8: memref<4x8x32xf32, #tpu.memory_space<vmem>>, %arg9: memref<1x32xf32, #tpu.memory_space<vmem>>, %arg10: memref<1x32xf32, #tpu.memory_space<vmem>>, %arg11: memref<1x8x32xf32, #tpu.memory_space<vmem>>, %arg12: memref<4x8x8xf32, #tpu.memory_space<vmem>>, %arg13: memref<4x8xf32, #tpu.memory_space<vmem>>, %arg14: memref<4x8xf32, #tpu.memory_space<vmem>>, %arg15: memref<4x8x8xf32, #tpu.memory_space<vmem>>) attributes {dimension_semantics = [#tpu.dimension_semantics<parallel>, #tpu.dimension_semantics<arbitrary>, #tpu.dimension_semantics<arbitrary>], iteration_bounds = array<i64: 2, 2, 1>, scalar_prefetch = 0 : i64, scratch_operands = 4 : i64, tpu.core_type = #tpu.core_type<tc>, window_params = [{transform_indices = @transform_0, window_bounds = array<i64: 1, 8, 32>}, {transform_indices = @transform_1, window_bounds = array<i64: 1, 1, 32, 16>}, {pipeline_mode = #tpu.pipeline_mode<synchronous>, transform_indices = @transform_2, window_bounds = array<i64: 32, 32>}, {pipeline_mode = #tpu.pipeline_mode<synchronous>, transform_indices = @transform_3, window_bounds = array<i64: 32, 32>}, {pipeline_mode = #tpu.pipeline_mode<synchronous>, transform_indices = @transform_4, window_bounds = array<i64: 32, 32>}, {pipeline_mode = #tpu.pipeline_mode<synchronous>, transform_indices = @transform_5, window_bounds = array<i64: 4, 8, 32>}, {pipeline_mode = #tpu.pipeline_mode<synchronous>, transform_indices = @transform_6, window_bounds = array<i64: 1, 32>}, {pipeline_mode = #tpu.pipeline_mode<synchronous>, transform_indices = @transform_7, window_bounds = array<i64: 1, 32>}, {transform_indices = @transform_8, window_bounds = array<i64: 1, 8, 32>}]} {
    %c0_i32 = arith.constant 0 : i32
    %0 = arith.cmpi eq, %arg1, %c0_i32 : i32
    %c0_i32_0 = arith.constant 0 : i32
    %1 = arith.cmpi eq, %arg2, %c0_i32_0 : i32
    %2 = arith.andi %0, %1 : i1
    %c1_i32 = arith.constant 1 : i32
    %3 = arith.cmpi eq, %arg1, %c1_i32 : i32
    %c0_i32_1 = arith.constant 0 : i32
    %4 = arith.cmpi eq, %arg2, %c0_i32_1 : i32
    %5 = arith.andi %3, %4 : i1
    %6 = arith.extui %2 : i1 to i32
    %c0_i32_2 = arith.constant 0 : i32
    %7 = arith.cmpi ne, %6, %c0_i32_2 : i32
    scf.if %7 {
      %cst_33 = arith.constant 0xFF800000 : f32
      %42 = vector.broadcast %cst_33 : f32 to vector<4x8xf32>
      %c0_34 = arith.constant 0 : index
      %c0_35 = arith.constant 0 : index
      %43 = vector.load %arg13[%c0_34, %c0_35] : memref<4x8xf32, #tpu.memory_space<vmem>>, vector<4x8xf32>
      tpu.vector_store %arg13[%c0_34, %c0_35], %42 {strides = array<i32>} : memref<4x8xf32, #tpu.memory_space<vmem>>, vector<4x8xf32>,
      %cst_36 = arith.constant 0.000000e+00 : f32
      %44 = vector.broadcast %cst_36 : f32 to vector<4x8xf32>
      %c0_37 = arith.constant 0 : index
      %c0_38 = arith.constant 0 : index
      %45 = vector.load %arg14[%c0_37, %c0_38] : memref<4x8xf32, #tpu.memory_space<vmem>>, vector<4x8xf32>
      tpu.vector_store %arg14[%c0_37, %c0_38], %44 {strides = array<i32>} : memref<4x8xf32, #tpu.memory_space<vmem>>, vector<4x8xf32>,
      %cst_39 = arith.constant 0.000000e+00 : f32
      %46 = vector.broadcast %cst_39 : f32 to vector<4x8x8xf32>
      %c0_40 = arith.constant 0 : index
      %c0_41 = arith.constant 0 : index
      %c0_42 = arith.constant 0 : index
      %47 = vector.load %arg15[%c0_40, %c0_41, %c0_42] : memref<4x8x8xf32, #tpu.memory_space<vmem>>, vector<4x8x8xf32>
      tpu.vector_store %arg15[%c0_40, %c0_41, %c0_42], %46 {strides = array<i32>} : memref<4x8x8xf32, #tpu.memory_space<vmem>>, vector<4x8x8xf32>,
      %c0_43 = arith.constant 0 : index
      %c0_44 = arith.constant 0 : index
      %c0_45 = arith.constant 0 : index
      %48 = vector.load %arg3[%c0_43, %c0_44, %c0_45] : memref<1x8x32xf32, #tpu.memory_space<vmem>>, vector<1x8x32xf32>
      %49 = vector.shape_cast %48 : vector<1x8x32xf32> to vector<8x32xf32>
      %c0_46 = arith.constant 0 : index
      %c0_47 = arith.constant 0 : index
      %50 = vector.load %arg5[%c0_46, %c0_47] : memref<32x32xf32, #tpu.memory_space<vmem>>, vector<8x32xf32>
      %cst_48 = arith.constant dense<0.000000e+00> : vector<8x8xf32>
      %51 = tpu.matmul %49, %50, %cst_48 {dimension_numbers = #tpu.dot_dimension_numbers<[1], [1], [0], [0], [0, 0, 1, 0], [], []>} : vector<8x32xf32>, vector<8x32xf32>, vector<8x8xf32> -> vector<8x8xf32>
      %c0_49 = arith.constant 0 : index
      %c0_50 = arith.constant 0 : index
      %c0_51 = arith.constant 0 : index
      %52 = vector.load %arg12[%c0_49, %c0_50, %c0_51] : memref<4x8x8xf32, #tpu.memory_space<vmem>>, vector<1x8x8xf32>
      %53 = vector.shape_cast %52 : vector<1x8x8xf32> to vector<8x8xf32>
      %54 = vector.shape_cast %51 : vector<8x8xf32> to vector<1x8x8xf32>
      tpu.vector_store %arg12[%c0_49, %c0_50, %c0_51], %54 {strides = array<i32>} : memref<4x8x8xf32, #tpu.memory_space<vmem>>, vector<1x8x8xf32>,
      %c8 = arith.constant 8 : index
      %c0_52 = arith.constant 0 : index
      %55 = vector.load %arg5[%c8, %c0_52] : memref<32x32xf32, #tpu.memory_space<vmem>>, vector<8x32xf32>
      %cst_53 = arith.constant dense<0.000000e+00> : vector<8x8xf32>
      %56 = tpu.matmul %49, %55, %cst_53 {dimension_numbers = #tpu.dot_dimension_numbers<[1], [1], [0], [0], [0, 0, 1, 0], [], []>} : vector<8x32xf32>, vector<8x32xf32>, vector<8x8xf32> -> vector<8x8xf32>
      %c1 = arith.constant 1 : index
      %c0_54 = arith.constant 0 : index
      %c0_55 = arith.constant 0 : index
      %57 = vector.load %arg12[%c1, %c0_54, %c0_55] : memref<4x8x8xf32, #tpu.memory_space<vmem>>, vector<1x8x8xf32>
      %58 = vector.shape_cast %57 : vector<1x8x8xf32> to vector<8x8xf32>
      %59 = vector.shape_cast %56 : vector<8x8xf32> to vector<1x8x8xf32>
      tpu.vector_store %arg12[%c1, %c0_54, %c0_55], %59 {strides = array<i32>} : memref<4x8x8xf32, #tpu.memory_space<vmem>>, vector<1x8x8xf32>,
      %c16 = arith.constant 16 : index
      %c0_56 = arith.constant 0 : index
      %60 = vector.load %arg5[%c16, %c0_56] : memref<32x32xf32, #tpu.memory_space<vmem>>, vector<8x32xf32>
      %cst_57 = arith.constant dense<0.000000e+00> : vector<8x8xf32>
      %61 = tpu.matmul %49, %60, %cst_57 {dimension_numbers = #tpu.dot_dimension_numbers<[1], [1], [0], [0], [0, 0, 1, 0], [], []>} : vector<8x32xf32>, vector<8x32xf32>, vector<8x8xf32> -> vector<8x8xf32>
      %c2 = arith.constant 2 : index
      %c0_58 = arith.constant 0 : index
      %c0_59 = arith.constant 0 : index
      %62 = vector.load %arg12[%c2, %c0_58, %c0_59] : memref<4x8x8xf32, #tpu.memory_space<vmem>>, vector<1x8x8xf32>
      %63 = vector.shape_cast %62 : vector<1x8x8xf32> to vector<8x8xf32>
      %64 = vector.shape_cast %61 : vector<8x8xf32> to vector<1x8x8xf32>
      tpu.vector_store %arg12[%c2, %c0_58, %c0_59], %64 {strides = array<i32>} : memref<4x8x8xf32, #tpu.memory_space<vmem>>, vector<1x8x8xf32>,
      %c24 = arith.constant 24 : index
      %c0_60 = arith.constant 0 : index
      %65 = vector.load %arg5[%c24, %c0_60] : memref<32x32xf32, #tpu.memory_space<vmem>>, vector<8x32xf32>
      %cst_61 = arith.constant dense<0.000000e+00> : vector<8x8xf32>
      %66 = tpu.matmul %49, %65, %cst_61 {dimension_numbers = #tpu.dot_dimension_numbers<[1], [1], [0], [0], [0, 0, 1, 0], [], []>} : vector<8x32xf32>, vector<8x32xf32>, vector<8x8xf32> -> vector<8x8xf32>
      %c3 = arith.constant 3 : index
      %c0_62 = arith.constant 0 : index
      %c0_63 = arith.constant 0 : index
      %67 = vector.load %arg12[%c3, %c0_62, %c0_63] : memref<4x8x8xf32, #tpu.memory_space<vmem>>, vector<1x8x8xf32>
      %68 = vector.shape_cast %67 : vector<1x8x8xf32> to vector<8x8xf32>
      %69 = vector.shape_cast %66 : vector<8x8xf32> to vector<1x8x8xf32>
      tpu.vector_store %arg12[%c3, %c0_62, %c0_63], %69 {strides = array<i32>} : memref<4x8x8xf32, #tpu.memory_space<vmem>>, vector<1x8x8xf32>,
    } else {
    }
    %c0 = arith.constant 0 : index
    %c0_3 = arith.constant 0 : index
    %c0_4 = arith.constant 0 : index
    %c0_5 = arith.constant 0 : index
    %8 = vector.load %arg4[%c0, %c0_3, %c0_4, %c0_5] : memref<1x1x32x16xf32, #tpu.memory_space<vmem>>, vector<1x1x32x16xf32>
    %9 = vector.shape_cast %8 : vector<1x1x32x16xf32> to vector<32x16xf32>
    %c0_6 = arith.constant 0 : index
    %c0_7 = arith.constant 0 : index
    %10 = vector.load %arg6[%c0_6, %c0_7] : memref<32x32xf32, #tpu.memory_space<vmem>>, vector<32x32xf32>
    %cst = arith.constant dense<0.000000e+00> : vector<32x16xf32>
    %11 = tpu.matmul %10, %9, %cst {dimension_numbers = #tpu.dot_dimension_numbers<[1], [0], [0], [1], [0, 0, 1, 1], [], []>} : vector<32x32xf32>, vector<32x16xf32>, vector<32x16xf32> -> vector<32x16xf32>
    %c0_8 = arith.constant 0 : index
    %c0_9 = arith.constant 0 : index
    %12 = vector.load %arg7[%c0_8, %c0_9] : memref<32x32xf32, #tpu.memory_space<vmem>>, vector<32x32xf32>
    %cst_10 = arith.constant dense<0.000000e+00> : vector<32x16xf32>
    %13 = tpu.matmul %12, %9, %cst_10 {dimension_numbers = #tpu.dot_dimension_numbers<[1], [0], [0], [1], [0, 0, 1, 1], [], []>} : vector<32x32xf32>, vector<32x16xf32>, vector<32x16xf32> -> vector<32x16xf32>
    %14 = vector.shape_cast %11 : vector<32x16xf32> to vector<4x8x16xf32>
    %15 = vector.shape_cast %13 : vector<32x16xf32> to vector<4x8x16xf32>
    %c0_11 = arith.constant 0 : index
    %c0_12 = arith.constant 0 : index
    %c0_13 = arith.constant 0 : index
    %16 = vector.load %arg12[%c0_11, %c0_12, %c0_13] : memref<4x8x8xf32, #tpu.memory_space<vmem>>, vector<4x8x8xf32>
    "tpu.trace_start"() <{level = 10 : i32, message = "hnd,hds->hns"}> : () -> ()
    %cst_14 = arith.constant dense<0.000000e+00> : vector<4x8x16xf32>
    %17 = tpu.matmul %16, %14, %cst_14 {dimension_numbers = #tpu.dot_dimension_numbers<[2], [1], [1], [2], [0, 0, 0, 1, 1, 2], [0], [0]>} : vector<4x8x8xf32>, vector<4x8x16xf32>, vector<4x8x16xf32> -> vector<4x8x16xf32>
    "tpu.trace_stop"() : () -> ()
    %c0_15 = arith.constant 0 : index
    %c0_16 = arith.constant 0 : index
    %18 = vector.load %arg13[%c0_15, %c0_16] : memref<4x8xf32, #tpu.memory_space<vmem>>, vector<4x8xf32>
    %cst_17 = arith.constant dense<0xFF800000> : vector<4x8xf32>
    %19 = vector.multi_reduction <maximumf>, %17, %cst_17 [2] : vector<4x8x16xf32> to vector<4x8xf32>
    %20 = arith.maximumf %18, %19 : vector<4x8xf32>
    %21 = arith.subf %18, %20 : vector<4x8xf32>
    %22 = math.exp %21 : vector<4x8xf32>
    %23 = vector.shape_cast %20 : vector<4x8xf32> to vector<4x8x1xf32>
    %24 = vector.broadcast %23 : vector<4x8x1xf32> to vector<4x8x16xf32>
    %25 = arith.subf %17, %24 : vector<4x8x16xf32>
    %26 = math.exp %25 : vector<4x8x16xf32>
    %c0_18 = arith.constant 0 : index
    %c0_19 = arith.constant 0 : index
    %27 = vector.load %arg14[%c0_18, %c0_19] : memref<4x8xf32, #tpu.memory_space<vmem>>, vector<4x8xf32>
    %28 = arith.mulf %22, %27 : vector<4x8xf32>
    %cst_20 = arith.constant dense<0.000000e+00> : vector<4x8xf32>
    %29 = vector.multi_reduction <add>, %26, %cst_20 [2] : vector<4x8x16xf32> to vector<4x8xf32>
    %30 = arith.addf %28, %29 : vector<4x8xf32>
    %c0_21 = arith.constant 0 : index
    %c0_22 = arith.constant 0 : index
    %31 = vector.load %arg14[%c0_21, %c0_22] : memref<4x8xf32, #tpu.memory_space<vmem>>, vector<4x8xf32>
    tpu.vector_store %arg14[%c0_21, %c0_22], %30 {strides = array<i32>} : memref<4x8xf32, #tpu.memory_space<vmem>>, vector<4x8xf32>,
    "tpu.trace_start"() <{level = 10 : i32, message = "hns,hjs->hnj"}> : () -> ()
    %cst_23 = arith.constant dense<0.000000e+00> : vector<4x8x8xf32>
    %32 = tpu.matmul %26, %15, %cst_23 {dimension_numbers = #tpu.dot_dimension_numbers<[2], [2], [1], [1], [0, 0, 0, 1, 1, 1], [0], [0]>} : vector<4x8x16xf32>, vector<4x8x16xf32>, vector<4x8x8xf32> -> vector<4x8x8xf32>
    "tpu.trace_stop"() : () -> ()
    %33 = vector.shape_cast %22 : vector<4x8xf32> to vector<4x8x1xf32>
    %c0_24 = arith.constant 0 : index
    %c0_25 = arith.constant 0 : index
    %c0_26 = arith.constant 0 : index
    %34 = vector.load %arg15[%c0_24, %c0_25, %c0_26] : memref<4x8x8xf32, #tpu.memory_space<vmem>>, vector<4x8x8xf32>
    %35 = vector.broadcast %33 : vector<4x8x1xf32> to vector<4x8x8xf32>
    %36 = arith.mulf %35, %34 : vector<4x8x8xf32>
    %37 = arith.addf %36, %32 : vector<4x8x8xf32>
    %c0_27 = arith.constant 0 : index
    %c0_28 = arith.constant 0 : index
    %c0_29 = arith.constant 0 : index
    %38 = vector.load %arg15[%c0_27, %c0_28, %c0_29] : memref<4x8x8xf32, #tpu.memory_space<vmem>>, vector<4x8x8xf32>
    tpu.vector_store %arg15[%c0_27, %c0_28, %c0_29], %37 {strides = array<i32>} : memref<4x8x8xf32, #tpu.memory_space<vmem>>, vector<4x8x8xf32>,
    %c0_30 = arith.constant 0 : index
    %c0_31 = arith.constant 0 : index
    %39 = vector.load %arg13[%c0_30, %c0_31] : memref<4x8xf32, #tpu.memory_space<vmem>>, vector<4x8xf32>
    tpu.vector_store %arg13[%c0_30, %c0_31], %20 {strides = array<i32>} : memref<4x8xf32, #tpu.memory_space<vmem>>, vector<4x8xf32>,
    %40 = arith.extui %5 : i1 to i32
    %c0_i32_32 = arith.constant 0 : i32
    %41 = arith.cmpi ne, %40, %c0_i32_32 : i32
    scf.if %41 {
      %c0_33 = arith.constant 0 : index
      %c0_34 = arith.constant 0 : index
      %c0_35 = arith.constant 0 : index
      %42 = vector.load %arg15[%c0_33, %c0_34, %c0_35] : memref<4x8x8xf32, #tpu.memory_space<vmem>>, vector<4x8x8xf32>
      %c0_36 = arith.constant 0 : index
      %c0_37 = arith.constant 0 : index
      %43 = vector.load %arg14[%c0_36, %c0_37] : memref<4x8xf32, #tpu.memory_space<vmem>>, vector<4x8xf32>
      %44 = vector.shape_cast %43 : vector<4x8xf32> to vector<4x8x1xf32>
      %45 = vector.broadcast %44 : vector<4x8x1xf32> to vector<4x8x8xf32>
      %46 = arith.divf %42, %45 : vector<4x8x8xf32>
      %c0_38 = arith.constant 0 : index
      %c0_39 = arith.constant 0 : index
      %c0_40 = arith.constant 0 : index
      %47 = vector.load %arg8[%c0_38, %c0_39, %c0_40] : memref<4x8x32xf32, #tpu.memory_space<vmem>>, vector<4x8x32xf32>
      "tpu.trace_start"() <{level = 10 : i32, message = "hnj,hjo->hno"}> : () -> ()
      %cst_41 = arith.constant dense<0.000000e+00> : vector<4x8x32xf32>
      %48 = tpu.matmul %46, %47, %cst_41 {dimension_numbers = #tpu.dot_dimension_numbers<[2], [1], [1], [2], [0, 0, 0, 1, 1, 2], [0], [0]>} : vector<4x8x8xf32>, vector<4x8x32xf32>, vector<4x8x32xf32> -> vector<4x8x32xf32>
      "tpu.trace_stop"() : () -> ()
      %cst_42 = arith.constant dense<0.000000e+00> : vector<8x32xf32>
      %49 = vector.multi_reduction <add>, %48, %cst_42 [0] : vector<4x8x32xf32> to vector<8x32xf32>
      %c0_43 = arith.constant 0 : index
      %c0_44 = arith.constant 0 : index
      %c0_45 = arith.constant 0 : index
      %50 = vector.load %arg3[%c0_43, %c0_44, %c0_45] : memref<1x8x32xf32, #tpu.memory_space<vmem>>, vector<1x8x32xf32>
      %51 = vector.shape_cast %50 : vector<1x8x32xf32> to vector<8x32xf32>
      %52 = arith.addf %49, %51 : vector<8x32xf32>
      %cst_46 = arith.constant dense<0.000000e+00> : vector<8xf32>
      %53 = vector.multi_reduction <add>, %52, %cst_46 [1] : vector<8x32xf32> to vector<8xf32>
      %54 = vector.shape_cast %53 : vector<8xf32> to vector<8x1xf32>
      %cst_47 = arith.constant 3.200000e+01 : f32
      %55 = vector.broadcast %cst_47 : f32 to vector<8x1xf32>
      %56 = arith.divf %54, %55 : vector<8x1xf32>
      %57 = vector.broadcast %56 : vector<8x1xf32> to vector<8x32xf32>
      %58 = arith.subf %52, %57 : vector<8x32xf32>
      %59 = vector.broadcast %56 : vector<8x1xf32> to vector<8x32xf32>
      %60 = arith.subf %52, %59 : vector<8x32xf32>
      %61 = arith.mulf %58, %60 : vector<8x32xf32>
      %cst_48 = arith.constant dense<0.000000e+00> : vector<8xf32>
      %62 = vector.multi_reduction <add>, %61, %cst_48 [1] : vector<8x32xf32> to vector<8xf32>
      %63 = vector.shape_cast %62 : vector<8xf32> to vector<8x1xf32>
      %cst_49 = arith.constant 3.200000e+01 : f32
      %64 = vector.broadcast %cst_49 : f32 to vector<8x1xf32>
      %65 = arith.divf %63, %64 : vector<8x1xf32>
      %66 = vector.broadcast %56 : vector<8x1xf32> to vector<8x32xf32>
      %67 = arith.subf %52, %66 : vector<8x32xf32>
      %cst_50 = arith.constant 9.99999997E-7 : f32
      %68 = vector.broadcast %cst_50 : f32 to vector<8x1xf32>
      %69 = arith.addf %65, %68 : vector<8x1xf32>
      %70 = math.rsqrt %69 : vector<8x1xf32>
      %71 = vector.broadcast %70 : vector<8x1xf32> to vector<8x32xf32>
      %72 = arith.mulf %67, %71 : vector<8x32xf32>
      %c0_51 = arith.constant 0 : index
      %c0_52 = arith.constant 0 : index
      %73 = vector.load %arg9[%c0_51, %c0_52] : memref<1x32xf32, #tpu.memory_space<vmem>>, vector<1x32xf32>
      %74 = vector.broadcast %73 : vector<1x32xf32> to vector<8x32xf32>
      %75 = arith.mulf %72, %74 : vector<8x32xf32>
      %c0_53 = arith.constant 0 : index
      %c0_54 = arith.constant 0 : index
      %76 = vector.load %arg10[%c0_53, %c0_54] : memref<1x32xf32, #tpu.memory_space<vmem>>, vector<1x32xf32>
      %77 = vector.broadcast %76 : vector<1x32xf32> to vector<8x32xf32>
      %78 = arith.addf %75, %77 : vector<8x32xf32>
      %c0_55 = arith.constant 0 : index
      %c0_56 = arith.constant 0 : index
      %c0_57 = arith.constant 0 : index
      %79 = vector.load %arg11[%c0_55, %c0_56, %c0_57] : memref<1x8x32xf32, #tpu.memory_space<vmem>>, vector<1x8x32xf32>
      %80 = vector.shape_cast %79 : vector<1x8x32xf32> to vector<8x32xf32>
      %81 = vector.shape_cast %78 : vector<8x32xf32> to vector<1x8x32xf32>
      tpu.vector_store %arg11[%c0_55, %c0_56, %c0_57], %81 {strides = array<i32>} : memref<1x8x32xf32, #tpu.memory_space<vmem>>, vector<1x8x32xf32>,
    } else {
    }
    return
  }
  func.func @transform_0(%arg0: i32, %arg1: i32, %arg2: i32) -> (i32, i32, i32) {
    %c0_i32 = arith.constant 0 : i32
    %c0_i32_0 = arith.constant 0 : i32
    %c0_i32_1 = arith.constant 0 : i32
    return %arg0, %c0_i32, %c0_i32_0 : i32, i32, i32
  }
  func.func @transform_1(%arg0: i32, %arg1: i32, %arg2: i32) -> (i32, i32, i32, i32) {
    %c0_i32 = arith.constant 0 : i32
    %c0_i32_0 = arith.constant 0 : i32
    return %arg0, %arg1, %c0_i32, %arg2 : i32, i32, i32, i32
  }
  func.func @transform_2(%arg0: i32, %arg1: i32, %arg2: i32) -> (i32, i32) {
    %c0_i32 = arith.constant 0 : i32
    %c0_i32_0 = arith.constant 0 : i32
    %c0_i32_1 = arith.constant 0 : i32
    return %c0_i32, %c0_i32_0 : i32, i32
  }
  func.func @transform_3(%arg0: i32, %arg1: i32, %arg2: i32) -> (i32, i32) {
    %c0_i32 = arith.constant 0 : i32
    %c0_i32_0 = arith.constant 0 : i32
    %c0_i32_1 = arith.constant 0 : i32
    return %c0_i32, %c0_i32_0 : i32, i32
  }
  func.func @transform_4(%arg0: i32, %arg1: i32, %arg2: i32) -> (i32, i32) {
    %c0_i32 = arith.constant 0 : i32
    %c0_i32_0 = arith.constant 0 : i32
    %c0_i32_1 = arith.constant 0 : i32
    return %c0_i32, %c0_i32_0 : i32, i32
  }
  func.func @transform_5(%arg0: i32, %arg1: i32, %arg2: i32) -> (i32, i32, i32) {
    %c0_i32 = arith.constant 0 : i32
    %c0_i32_0 = arith.constant 0 : i32
    %c0_i32_1 = arith.constant 0 : i32
    %c0_i32_2 = arith.constant 0 : i32
    return %c0_i32, %c0_i32_0, %c0_i32_1 : i32, i32, i32
  }
  func.func @transform_6(%arg0: i32, %arg1: i32, %arg2: i32) -> (i32, i32) {
    %c0_i32 = arith.constant 0 : i32
    %c0_i32_0 = arith.constant 0 : i32
    %c0_i32_1 = arith.constant 0 : i32
    return %c0_i32, %c0_i32_0 : i32, i32
  }
  func.func @transform_7(%arg0: i32, %arg1: i32, %arg2: i32) -> (i32, i32) {
    %c0_i32 = arith.constant 0 : i32
    %c0_i32_0 = arith.constant 0 : i32
    %c0_i32_1 = arith.constant 0 : i32
    return %c0_i32, %c0_i32_0 : i32, i32
  }
  func.func @transform_8(%arg0: i32, %arg1: i32, %arg2: i32) -> (i32, i32, i32) {
    %c0_i32 = arith.constant 0 : i32
    %c0_i32_0 = arith.constant 0 : i32
    %c0_i32_1 = arith.constant 0 : i32
    return %arg0, %c0_i32, %c0_i32_0 : i32, i32, i32
  }
}

</mosaic_0001>

<bundles_post_ra>
// kernel: tpu_custom_call.1
= control target key start
LH: loop header
LB: loop body
LE: loop exit
PB: predicated region body
PF: predicated region fallthrough
CT: control target
= control target key end

     0   :  { %13 = vsyncpa [#allocation7], 0  ;;  %s2977_s0 = inlined_call_operand.vmem [shape: f32[2,8,32], index: 0, kind: input, shape index: {}]   ;;  %s2978_s1 = inlined_call_operand.vmem [shape: f32[2,2,32,16], index: 1, kind: input, shape index: {}]   ;;  %s2979_s2 = inlined_call_operand.vmem [shape: f32[32,32], index: 2, kind: input, shape index: {}]   ;;  %s2980_s3 = inlined_call_operand.vmem [shape: f32[32,32], index: 3, kind: input, shape index: {}]   ;;  %s2981_s4 = inlined_call_operand.vmem [shape: f32[32,32], index: 4, kind: input, shape index: {}]   ;;  %s2982_s5 = inlined_call_operand.vmem [shape: f32[4,8,32], index: 5, kind: input, shape index: {}]   ;;  %s2983_s6 = inlined_call_operand.vmem [shape: f32[1,32], index: 6, kind: input, shape index: {}]   ;;  %s2984_s7 = inlined_call_operand.vmem [shape: f32[1,32], index: 7, kind: input, shape index: {}]   ;;  %s2985_s8 = inlined_call_operand.hbm [shape: f32[2,8,32], index: 8, kind: output, shape index: {}]  }
   0x1   :  { %15 = vsyncpa [#allocation7 + $0x1], 0  ;;  %s2632_s27 = smov 0   ;;  %s2634_s28 = smov 0  }
   0x2   :  { %s2636_s29 = smov 0   ;;  %s2638_s30 = smov 0  }
   0x3   :  { %s2640_s9 = smov 0   ;;  %s2642_s10 = smov 0  }
   0x4   :  { %s2644_s11 = smov 0   ;;  %s2646_s12 = smov 0  }
   0x5 LB: > { %2992 = sst [smem:[#allocation9_spill]] %s2557_s29  ;;  %s2161_s13 = sadd.s32 4294967295, %s2577_s12   ;;  %s2577_s12 = sphi %s2646_s12, %s21_s12   ;;  %s2573_s11 = sphi %s2644_s11, %s3008_s11   ;;  %s2569_s10 = sphi %s2642_s10, %s3007_s10   ;;  %s2565_s9 = sphi %s2640_s9, %s3006_s9   ;;  %s2561_s30 = sphi %s2638_s30, %s3005_s30   ;;  %s2557_s29 = sphi %s2636_s29, %s3004_s29   ;;  %s2553_s28 = sphi %s2634_s28, %s3010_s28   ;;  %s2549_s27 = sphi %s2632_s27, %s3009_s27  }
   0x6   : > { %2993 = sst [smem:[#allocation10_spill]] %s2569_s10  ;;  %s2162_s14 = sadd.s32 4294967294, %s2577_s12  }
   0x7   : > { %2994 = sst [smem:[#allocation11_spill]] %s2573_s11  ;;  %s36_s15 = sadd.s32 1, %s2569_s10 }
   0x8   : > { %p38_p0 = scmp.ge.s32.totalorder %s36_s15, 2  ;;  %s40_s16 = sadd.s32 1, %s2573_s11 }
   0x9   : > { %p239_p1 = scmp.ne.s32.totalorder %s2557_s29, %s2553_s28  ;;  %p240_p2 = scmp.eq.s32.totalorder %s2161_s13, 3 }
   0xa   : > { %s3012_s15 = smov (%p38_p0, %s36_s15), 0  ;;  %s3014_s16 = smov (!%p38_p0, %s40_s16), %s2573_s11 }
   0xb   : > { %2995 = sst [smem:[#allocation12_spill]] %s3012_s15  ;;  %p2681_p3 = por %p240_p2, %p239_p1 }
   0xc   : > { %p245_p4 = scmp.ne.s32.totalorder %s2553_s28, %s2549_s27  ;;  %p42_p5 = scmp.ge.s32.totalorder %s3014_s16, 2 }
   0xd   : > { %p246_p6 = scmp.eq.s32.totalorder %s2162_s14, 3  ;;  %p2165_p7 = scmp.ge.s32.totalorder %s2577_s12, 1 }
   0xe   : > { %p304_p8 = scmp.lt.s32.totalorder %s2577_s12, 5  ;;  %s3016_s16 = smov (%p42_p5, %s3014_s16), 0 }
   0xf   : > { %2997 = sst [smem:[#allocation13_spill]] %s3016_s16  ;;  %p2691_p9 = por %p246_p6, %p245_p4 }
  0x10   : > { %p305_p10 = pnand %p2165_p7, %p304_p8  ;;  %s226_s19 = ssub.s32 %s2573_s11, %s3016_s16 }
  0x11   : > { %s2998_s18 = scalar_select %p2691_p9, 1, 0 }
  0x12   : > { %s229_s20 = sadd.s32 1, %s2557_s29  ;;  %p227_p11 = scmp.eq.s32.totalorder %s226_s19, 0 }
  0x13   : > { %2999 = sst [smem:[#allocation14_spill]] %s2998_s18  ;;  %308 = sbr.rel (%p305_p10) target bundleno = 1836 (0x72c), region = 52 }
  0x14   : > { %s2699_s21 = scalar_select %p227_p11, %s2557_s29, %s229_s20  }
  0x15   : > { %s2989_s22 = sand.u32 (!%p305_p10), 1, %s2553_s28   ;;  %p349_p12 = scmp.lt.s32.totalorder (!%p305_p10), %s2565_s9, 1 }
  0x16   : > { %3000 = sst [smem:[#allocation15_spill]] %s2699_s21  ;;  %s2705_s23 = sshll.u32 (!%p305_p10), %s2989_s22, 3 }
  0x17   : > { %p355_p13 = scmp.lt.s32.totalorder (!%p305_p10), %s2561_s30, 1  ;;  %p365_p0 = scmp.eq.s32.totalorder (!%p305_p10), %s2561_s30, 0 }
  0x18   : > { %p369_p1 = scmp.eq.s32.totalorder (!%p305_p10), %s2561_s30, 1  ;;  %s348_s21 = scalar_lea.vmem (!%p305_p10), [#allocation6], %s2705_s23 }
  0x1a   : > { %s350_s24 = scalar_select %p349_p12, %s2565_s9, 1 }
  0x1b   : > { %s356_s25 = scalar_select %p355_p13, %s2561_s30, 1 }
  0x1c   : > { %s2167_s26 = sshll.u32 %s350_s24, 3  ;;  %373 = sbr.rel (!%p365_p0) target bundleno = 251 (0xfb), region = 56  ;;  %vm374_vm0 = vcmask (%p365_p0), 60416   ;;  %v383_v0 = vld [vmem:[%s2979_s2] sm:$0xff] (%p365_p0)  ;;  %vm384_vm1 = vcmask (%p365_p0), 261120   ;;  %v462_v1 = vld [vmem:[%s2979_s2 + $0x8] sm:$0xff] (%p365_p0) }
  0x1d   : > { %s2715_s19 = scalar_lea.vmem %s2977_s0, %s2167_s26  ;;  %s2168_s20 = sshll.u32 %s356_s25, 2  ;;  %v2579_v2 = vmov (%p365_p0), -inf   ;;  %v2580_v3 = vmov (%p365_p0), 0.0   ;;  %vm377_vm2 = vcmask (%p365_p0), 64512   ;;  %vm2581_vm3 = vmmov (%p365_p0), 0   ;;  %v538_v5 = vld [vmem:[%s2979_s2 + $0x10] sm:$0xff] (%p365_p0) }
  0x1e   : > { %s362_s16 = sadd.s32 %s2168_s20, %s2167_s26  ;;  %375 = vst.msk [vmem:[#allocation3] sm:$0xf] (%p365_p0), %vm374_vm0, %v2579_v2  ;;  %376 = vst.msk [vmem:[#allocation4] sm:$0xf] (%p365_p0), %vm374_vm0, %v2580_v3  ;;  %2261 = vmatprep.subr.mxu0 (%p365_p0), %v2580_v3  ;;  %2266 = vmatprep.subr.mxu1 (%p365_p0), %v2580_v3  ;;  %v382_v4 = vld [vmem:[%s2715_s19] sm:$0xff] (%p365_p0)  ;;  %v614_v6 = vld [vmem:[%s2979_s2 + $0x18] sm:$0xff] (%p365_p0) }
  0x1f   : > { %s2170_s15 = sshll.u32 %s362_s16, 3  ;;  %2262 = vmatpush3.xpose.msk.msra.mxu0 (%p365_p0), %vm384_vm1, %v383_v0  ;;  %2267 = vmatpush3.xpose.msk.msra.mxu1 (%p365_p0), %vm384_vm1, %v462_v1  ;;  %378 = vst.msk [vmem:[#allocation5] sm:$0xff] (%p365_p0), %vm377_vm2, %v2580_v3  ;;  %379 = vst.msk [vmem:[#allocation5 + $0x8] sm:$0xff] (%p365_p0), %vm377_vm2, %v2580_v3 }
  0x20   : > { %s2720_s22 = scalar_lea.vmem %s2978_s1, %s2170_s15  ;;  %380 = vst.msk [vmem:[#allocation5 + $0x10] sm:$0xff] (%p365_p0), %vm377_vm2, %v2580_v3  ;;  %381 = vst.msk [vmem:[#allocation5 + $0x18] sm:$0xff] (%p365_p0), %vm377_vm2, %v2580_v3  ;;  %2263 = vmatprep.mubr.msk.f32.mxu0 (%p365_p0), %vm2581_vm3, %v2580_v3  ;;  %2268 = vmatprep.mubr.msk.f32.mxu1 (%p365_p0), %vm2581_vm3, %v2580_v3 }
  0x21   : > { %2271 = vmatprep.subr.mxu0 (%p365_p0), %v2580_v3  ;;  %2276 = vmatprep.subr.mxu1 (%p365_p0), %v2580_v3 }
  0x22   : > { %2264 = vmatmul.mubr.msk.f32.vlgmr.msra.gmra.mrb[0].mxu0 (%p365_p0), %vm384_vm1, %v382_v4  ;;  %2269 = vmatmul.mubr.msk.f32.vlgmr.msra.gmra.mrb[0].mxu1 (%p365_p0), %vm384_vm1, %v382_v4 }
  0x23   : > { %2272 = vmatpush3.xpose.msk.msra.mxu0 %vm384_vm1, %v538_v5  ;;  %2277 = vmatpush3.xpose.msk.msra.mxu1 %vm384_vm1, %v614_v6 }
  0x24   : > { %2273 = vmatprep.mubr.msk.f32.mxu0 %vm2581_vm3, %v2580_v3  ;;  %2278 = vmatprep.mubr.msk.f32.mxu1 %vm2581_vm3, %v2580_v3 }
  0x26   : > { %2274 = vmatmul.mubr.msk.f32.vlgmr.msra.gmra.mrb[2].mxu0 %vm384_vm1, %v382_v4  ;;  %2279 = vmatmul.mubr.msk.f32.vlgmr.msra.gmra.mrb[2].mxu1 %vm384_vm1, %v382_v4 }
  0xf5   : > { %v457_v7 = vpop.f32.mrb[0].mxu0  ;;  %v532_v8 = vpop.f32.mrb[0].mxu1 }
  0xf6   : > { %461 = vst.msk [vmem:[#allocation2] sm:$0xff] %vm377_vm2, %v457_v7  ;;  %537 = vst.msk [vmem:[#allocation2 + $0x8] sm:$0xff] %vm377_vm2, %v532_v8  ;;  %v2265_v9 = vpop.f32.mrb[1].mxu0  ;;  %v2270_v10 = vpop.f32.mrb[1].mxu1 }
  0xf9   : > { %v608_v11 = vpop.f32.mrb[2].mxu0  ;;  %v684_v12 = vpop.f32.mrb[2].mxu1 }
  0xfa   : > { %613 = vst.msk [vmem:[#allocation2 + $0x10] sm:$0xff] %vm377_vm2, %v608_v11  ;;  %689 = vst.msk [vmem:[#allocation2 + $0x18] sm:$0xff] %vm377_vm2, %v684_v12  ;;  %v2275_v13 = vpop.f32.mrb[3].mxu0  ;;  %v2280_v14 = vpop.f32.mrb[3].mxu1 }
  0xfb PF: > { %v690_v15 = vld [vmem:[%s2720_s22] sm:$0xff]  ;;  %v691_v16 = vld [vmem:[%s2720_s22 + $0x8] sm:$0xff]  ;;  %v692_v17 = vld [vmem:[%s2720_s22 + $0x10] sm:$0xff]  ;;  %vm698_vm4 = vcmask 261120   ;;  %v2582_v28 = vmov 0.0   ;;  %vm2583_vm5 = vmmov 0   ;;  %v1212_v54 = vlaneseq }
  0xfc   : > { %v2369_v18 = vpack.c.bf16 %v691_v16, %v690_v15  ;;  %v693_v19 = vld [vmem:[%s2720_s22 + $0x18] sm:$0xff]  ;;  %v694_v20 = vld [vmem:[%s2980_s3] sm:$0xff]  ;;  %v695_v23 = vld [vmem:[%s2980_s3 + $0x8] sm:$0xff]  ;;  %vm901_vm6 = vcmask 64512   ;;  %vm1195_vm7 = vcmask 130048   ;;  %vm1230_vm8 = vcmask 1041409  }
  0xfd   : > { %v2373_v21 = vpack.c.bf16 %v693_v19, %v692_v17  ;;  %2289 = vmatprep.mubr.msk.f32.mxu0 %vm698_vm4, %v694_v20  ;;  %v796_v22 = vld [vmem:[%s2981_s4] sm:$0xff]  ;;  %v797_v24 = vld [vmem:[%s2981_s4 + $0x8] sm:$0xff]  ;;  %v696_v25 = vld [vmem:[%s2980_s3 + $0x10] sm:$0xff]  ;;  %v1213_v55 = vand.u32 127, %v1212_v54  ;;  %v1215_v56 = vshrl.u32 %v1212_v54, 7  ;;  %vm1232_vm9 = vcmask 1042434  }
  0xfe   : > { %2370 = vmatprep.subr.bf16.mxu0 %v2369_v18  ;;  %2378 = vmatprep.subr.bf16.mxu1 %v2369_v18  ;;  %v697_v26 = vld [vmem:[%s2980_s3 + $0x18] sm:$0xff]  ;;  %v798_v27 = vld [vmem:[%s2981_s4 + $0x10] sm:$0xff]  ;;  %v898_v30 = vld [vmem:[#allocation2 + $0x8] sm:$0xff]  ;;  %vm1234_vm10 = vcmask 1043459   ;;  %vm1320_vm11 = vcmask 60416   ;;  %vm2585_vm12 = vmmov (%p369_p1), 0  }
  0xff   : > { %2372 = vmatpush3.bf16.msra.mxu0 %v2369_v18  ;;  %2380 = vmatpush3.bf16.msra.mxu1 %v2369_v18  ;;  %v799_v29 = vld [vmem:[%s2981_s4 + $0x18] sm:$0xff]  ;;  %v897_v32 = vld [vmem:[#allocation2] sm:$0xff]  ;;  %v2825_v58 = vsub.s32 %v1213_v55, %v1215_v56  ;;  %v2833_v5 = vsub.s32 1, %v1215_v56  ;;  %v2835_v6 = vsub.s32 0, %v1215_v56  ;;  %v2841_v12 = vsub.s32 2, %v1215_v56 }
 0x100   : > { %2374 = vmatprep.subr.bf16.mxu0 %v2373_v21  ;;  %2382 = vmatprep.subr.bf16.mxu1 %v2373_v21  ;;  %v1194_v2 = vld [vmem:[#allocation3] sm:$0xf]  ;;  %v2844_v15 = vsub.s32 3, %v1215_v56 }
 0x101   : > { %2303 = vmatprep.mubr.msk.f32.mxu1 %vm698_vm4, %v796_v22  ;;  %v900_v35 = vld [vmem:[#allocation2 + $0x18] sm:$0xff]  ;;  %v899_v37 = vld [vmem:[#allocation2 + $0x10] sm:$0xff] }
 0x103   : > { %2376 = vmatpush3.bf16.msra.mxu0 %v2373_v21  ;;  %2384 = vmatpush3.bf16.msra.mxu1 %v2373_v21 }
 0x104   : > { %2314 = vmatprep.subr.mxu1 %v2582_v28  ;;  %2309 = vmatprep.subr.mxu0 %v2582_v28 }
 0x106   : > { %2290 = vmatmul.mubr.msk.f32.vlgmr.msra.gmra.mrb[0].mxu0 %vm698_vm4, %v695_v23  ;;  %2304 = vmatmul.mubr.msk.f32.vlgmr.msra.gmra.mrb[0].mxu1 %vm698_vm4, %v797_v24 }
 0x107   : > { %2292 = vmatprep.mubr.msk.f32.mxu0 %vm698_vm4, %v696_v25  ;;  %2306 = vmatprep.mubr.msk.f32.mxu1 %vm698_vm4, %v798_v27 }
 0x10a   : > { %2293 = vmatmul.mubr.msk.f32.gmra.mrb[2].mxu0 %vm698_vm4, %v697_v26  ;;  %2307 = vmatmul.mubr.msk.f32.gmra.mrb[2].mxu1 %vm698_vm4, %v799_v29 }
 0x10b   : > { %2311 = vmatprep.mubr.msk.f32.mxu0 %vm2583_vm5, %v2582_v28  ;;  %2316 = vmatprep.mubr.msk.f32.mxu1 %vm2583_vm5, %v2582_v28 }
 0x1d9   : > { %v2291_v31 = vpop.f32.mrb[0].mxu0  ;;  %v2305_v33 = vpop.f32.mrb[0].mxu1 }
 0x1da   : > { %v777_v34 = vpop.f32.mrb[1].mxu0  ;;  %2315 = vmatpush3.msra.mxu1 %v2291_v31  ;;  %v878_v39 = vpop.f32.mrb[1].mxu1 }
 0x1db   : > { %2310 = vmatpush3.msra.mxu0 %v777_v34  ;;  %2317 = vmatmul.mubr.msk.f32.vlgmr.msra.gmra.mrb[4].mxu1 %vm901_vm6, %v898_v30 }
 0x1dc   : > { %2312 = vmatmul.mubr.msk.f32.vlgmr.msra.gmra.mrb[4].mxu0 %vm901_vm6, %v897_v32  ;;  %2319 = vmatprep.subr.mxu0 %v2582_v28 }
 0x1dd   : > { %v2294_v36 = vpop.f32.mrb[2].mxu0  ;;  %2321 = vmatprep.mubr.msk.f32.mxu0 %vm2583_vm5, %v2582_v28  ;;  %2324 = vmatprep.subr.mxu1 %v2582_v28  ;;  %v2814_v40 = vpop.f32.mrb[2].mxu1 }
 0x1de   : > { %v787_v38 = vpop.f32.mrb[3].mxu0  ;;  %2325 = vmatpush3.msra.mxu1 %v2294_v36  ;;  %2326 = vmatprep.mubr.msk.f32.mxu1 %vm2583_vm5, %v2582_v28  ;;  %v2816_v41 = vpop.f32.mrb[3].mxu1 }
 0x1df   : > { %2320 = vmatpush3.msra.mxu0 %v787_v38  ;;  %2327 = vmatmul.mubr.msk.f32.vlgmr.msra.gmra.mrb[6].mxu1 %vm901_vm6, %v900_v35 }
 0x1e0   : > { %2322 = vmatmul.mubr.msk.f32.vlgmr.msra.gmra.mrb[6].mxu0 %vm901_vm6, %v899_v37  ;;  %2329 = vmatprep.subr.mxu0 %v2582_v28 }
 0x1e1   : > { %2334 = vmatprep.subr.mxu1 %v2582_v28  ;;  %2331 = vmatprep.mubr.msk.f32.mxu0 %vm2583_vm5, %v2582_v28 }
 0x1e2   : > { %2336 = vmatprep.mubr.msk.f32.mxu1 %vm2583_vm5, %v2582_v28 }
 0x1e5   : > { %2335 = vmatpush3.xpose.msk.msra.mxu1 %vm1195_vm7, %v2305_v33 }
 0x1e6   : > { %2330 = vmatpush3.xpose.msk.msra.mxu0 %vm1195_vm7, %v878_v39  ;;  %2344 = vmatprep.subr.mxu1 %v2582_v28 }
 0x1e7   : > { %2339 = vmatprep.subr.mxu0 %v2582_v28 }
 0x2ae   : > { %v1044_v42 = vpop.f32.mrb[4].mxu1 }
 0x2af   : > { %v971_v43 = vpop.f32.mrb[4].mxu0  ;;  %v2318_v44 = vpop.f32.mrb[5].mxu1  ;;  %v1199_v48 = vsel %vm1195_vm7, %v1044_v42, -inf }
 0x2b0   : > { %v2313_v45 = vpop.f32.mrb[5].mxu0  ;;  %v1196_v46 = vsel %vm1195_vm7, %v971_v43, -inf }
 0x2b1   : > { %1197 = vmax.xlane.f32.xlu0 %v1196_v46 }
 0x2b2   : > { %v2819_v47 = vpop.f32.mrb[6].mxu1 }
 0x2b3   : > { %v1117_v49 = vpop.f32.mrb[6].mxu0  ;;  %v2328_v50 = vpop.f32.mrb[7].mxu1  ;;  %v1205_v53 = vsel %vm1195_vm7, %v2819_v47, -inf }
 0x2b4   : > { %v1202_v51 = vsel %vm1195_vm7, %v1117_v49, -inf  ;;  %v2323_v52 = vpop.f32.mrb[7].mxu0 }
 0x2b5   : > { %1203 = vmax.xlane.f32.xlu1 %v1202_v51  ;;  %1200 = vmax.xlane.f32.xlu0 %v1199_v48  ;;  %v1281_v48 = vld [vmem:[#allocation4] sm:$0xf] }
 0x2b9   : > { %1206 = vmax.xlane.f32.xlu1 %v1205_v53 }
 0x33e   : > { %v1198_v57 = vpop.xlane.xlu0 %1197 }
 0x33f   : > { %v1217_v61 = vrot.slane %v1198_v57, %v2825_v58  ;;  %v1655_v57 = vld [vmem:[#allocation5 + $0x8] sm:$0xff] }
 0x342   : > { %v1204_v59 = vpop.xlane.xlu1 %1203  ;;  %v1201_v60 = vpop.xlane.xlu0 %1200 }
 0x343   : > { %v1221_v62 = vrot.slane %v1201_v60, %v2825_v58  ;;  %v1225_v63 = vrot.slane %v1204_v59, %v2825_v58  ;;  %v1654_v59 = vld [vmem:[#allocation5] sm:$0xff] }
 0x345   : > { %v1231_v0 = vsel %vm1230_vm8, %v1221_v62, %v1217_v61 }
 0x346   : > { %v1207_v1 = vpop.xlane.xlu1 %1206  ;;  %v1233_v4 = vsel %vm1232_vm9, %v1225_v63, %v1231_v0 }
 0x347   : > { %v1229_v3 = vrot.slane %v1207_v1, %v2825_v58  ;;  %v1656_v1 = vld [vmem:[#allocation5 + $0x10] sm:$0xff] }
 0x349   : > { %v1235_v7 = vsel %vm1234_vm10, %v1229_v3, %v1233_v4 }
 0x34a   : > { %v1237_v8 = vmax.f32 %v1194_v2, %v1235_v7 }
 0x34c   : > { %v1238_v9 = vsub.f32 %v1194_v2, %v1237_v8  ;;  %1670 = vst.msk [vmem:[#allocation3] sm:$0xf] %vm1320_vm11, %v1237_v8  ;;  %v1251_v10 = vrot.slane %v1237_v8, %v2833_v5  ;;  %v1244_v11 = vrot.slane %v1237_v8, %v2835_v6  ;;  %v1258_v14 = vrot.slane %v1237_v8, %v2841_v12 }
 0x34d   : > { %v1265_v16 = vrot.slane %v1237_v8, %v2844_v15 }
 0x34e   : > { %v1239_v13 = vmul.f32 1.442695, %v1238_v9  ;;  %1253 = vbcast.lane.b32.xlu1 %v1251_v10, 256  ;;  %1246 = vbcast.lane.b32.xlu0 %v1244_v11, 256  ;;  %v1657_v9 = vld [vmem:[#allocation5 + $0x18] sm:$0xff] }
 0x350   : > { %2463 = vpow2.f32 %v1239_v13 }
 0x352   : > { %1260 = vbcast.lane.b32.xlu1 %v1258_v14, 256 }
 0x356   : > { %1267 = vbcast.lane.b32.xlu1 %v1265_v16, 256 }
 0x35a   : > { %v2464_v17 = vpop.eup %2463 }
 0x35b   : > { %v1636_v18 = vrot.slane %v2464_v17, %v2833_v5  ;;  %v1643_v19 = vrot.slane %v2464_v17, %v2841_v12  ;;  %v1650_v20 = vrot.slane %v2464_v17, %v2844_v15  ;;  %v1629_v21 = vrot.slane %v2464_v17, %v2835_v6 }
 0x35c   : > { %v1282_v53 = vmul.f32 %v2464_v17, %v1281_v48 }
 0x3c0   : > { %v1254_v22 = vpop.permute.xlu1 %1253  ;;  %v1247_v23 = vpop.permute.xlu0 %1246 }
 0x3c1   : > { %v1270_v24 = vsub.f32 %v1044_v42, %v1254_v22  ;;  %v1269_v25 = vsub.f32 %v971_v43, %v1247_v23 }
 0x3c3   : > { %v1275_v26 = vmul.f32 1.442695, %v1270_v24  ;;  %v1273_v27 = vmul.f32 1.442695, %v1269_v25  ;;  %v2584_v24 = vmov (%p369_p1), 0.0  }
 0x3c4   : > { %v1261_v29 = vpop.permute.xlu1 %1260 }
 0x3c5   : > { %2465 = vpow2.f32 %v1275_v26  ;;  %v1271_v30 = vsub.f32 %v1117_v49, %v1261_v29 }
 0x3c6   : > { %2467 = vpow2.f32 %v1273_v27  ;;  %v1715_v27 = vld [vmem:[%s2982_s5 + $0x8] sm:$0xff] (%p369_p1) }
 0x3c7   : > { %v1277_v31 = vmul.f32 1.442695, %v1271_v30 }
 0x3c8   : > { %v1268_v32 = vpop.permute.xlu1 %1267 }
 0x3c9   : > { %2469 = vpow2.f32 %v1277_v31  ;;  %v1272_v33 = vsub.f32 %v2819_v47, %v1268_v32 }
 0x3cb   : > { %v1279_v34 = vmul.f32 1.442695, %v1272_v33 }
 0x3cd   : > { %2471 = vpow2.f32 %v1279_v34  ;;  %v1716_v34 = vld [vmem:[%s2982_s5 + $0x10] sm:$0xff] (%p369_p1) }
 0x3cf   : > { %v2466_v35 = vpop.eup %2465 }
 0x3d0   : > { %v2468_v36 = vpop.eup %2467  ;;  %2337 = vmatmul.mubr.msk.f32.vlgmr.msra.gmra.mrb[8].mxu1 %vm1195_vm7, %v2466_v35  ;;  %v1286_v37 = vsel %vm1195_vm7, %v2466_v35, 0.0 }
 0x3d1   : > { %2332 = vmatmul.mubr.msk.f32.vlgmr.msra.gmra.mrb[8].mxu0 %vm1195_vm7, %v2468_v36  ;;  %2345 = vmatpush3.xpose.msk.msra.mxu1 %vm1195_vm7, %v2814_v40  ;;  %v1283_v38 = vsel %vm1195_vm7, %v2468_v36, 0.0 }
 0x3d2   : > { %2340 = vmatpush3.xpose.msk.msra.mxu0 %vm1195_vm7, %v2816_v41  ;;  %1287 = vadd.xlane.f32.xlu1 %v1286_v37 }
 0x3d3   : > { %v2470_v39 = vpop.eup %2469  ;;  %1284 = vadd.xlane.f32.xlu0 %v1283_v38  ;;  %2341 = vmatprep.mubr.msk.f32.mxu0 %vm2583_vm5, %v2582_v28 }
 0x3d4   : > { %v1289_v42 = vsel %vm1195_vm7, %v2470_v39, 0.0  ;;  %2346 = vmatprep.mubr.msk.f32.mxu1 %vm2583_vm5, %v2582_v28  ;;  %2349 = vmatprep.subr.mxu0 (%p369_p1), %v2584_v24 }
 0x3d5   : > { %2342 = vmatmul.mubr.msk.f32.vlgmr.msra.gmra.mrb[10].mxu0 %vm1195_vm7, %v2470_v39  ;;  %2354 = vmatprep.subr.mxu1 (%p369_p1), %v2584_v24 }
 0x3d6   : > { %2351 = vmatprep.mubr.msk.f32.mxu0 (%p369_p1), %vm2585_vm12, %v2584_v24 }
 0x3d7   : > { %v2472_v43 = vpop.eup %2471  ;;  %1290 = vadd.xlane.f32.xlu0 %v1289_v42 }
 0x3d8   : > { %2347 = vmatmul.mubr.msk.f32.vlgmr.msra.gmra.mrb[10].mxu1 %vm1195_vm7, %v2472_v43  ;;  %v1292_v40 = vsel %vm1195_vm7, %v2472_v43, 0.0  ;;  %v1717_v43 = vld [vmem:[%s2982_s5 + $0x18] sm:$0xff] (%p369_p1) }
 0x3d9   : > { %2355 = vmatpush3.msra.mxu1 (%p369_p1), %v1715_v27  ;;  %2356 = vmatprep.mubr.msk.f32.mxu1 (%p369_p1), %vm2585_vm12, %v2584_v24 }
 0x3da   : > { %2364 = vmatprep.subr.mxu1 (%p369_p1), %v2584_v24 }
 0x3db   : > { %1293 = vadd.xlane.f32.xlu0 %v1292_v40 }
 0x3e3   : > { %1638 = vbcast.lane.b32.xlu1 %v1636_v18, 256 }
 0x3e7   : > { %1645 = vbcast.lane.b32.xlu1 %v1643_v19, 256 }
 0x3eb   : > { %1652 = vbcast.lane.b32.xlu1 %v1650_v20, 256 }
 0x3f1   : > { %1631 = vbcast.lane.b32.xlu0 %v1629_v21, 256  ;;  %v1714_v21 = vld [vmem:[%s2982_s5] sm:$0xff] (%p369_p1) }
 0x3f2   : > { %2350 = vmatpush3.msra.mxu0 (%p369_p1), %v1714_v21 }
 0x3f3   : > { %2359 = vmatprep.subr.mxu0 (%p369_p1), %v2584_v24 }
 0x45f   : > { %v1288_v44 = vpop.xlane.xlu1 %1287 }
 0x460   : > { %v1285_v41 = vpop.xlane.xlu0 %1284  ;;  %v1306_v46 = vrot.slane %v1288_v44, %v2825_v58 }
 0x461   : > { %v1302_v28 = vrot.slane %v1285_v41, %v2825_v58 }
 0x463   : > { %v1315_v50 = vsel %vm1230_vm8, %v1306_v46, %v1302_v28  ;;  %v1639_v56 = vpop.permute.xlu1 %1638 }
 0x464   : > { %v1291_v45 = vpop.xlane.xlu0 %1290  ;;  %v1659_v62 = vmul.f32 %v1655_v57, %v1639_v56  ;;  %v2017_v56 = vld [vmem:[%s2715_s19] sm:$0xff] (%p369_p1) }
 0x465   : > { %v1310_v47 = vrot.slane %v1291_v45, %v2825_v58 }
 0x467   : > { %v1316_v52 = vsel %vm1232_vm9, %v1310_v47, %v1315_v50  ;;  %v1646_v61 = vpop.permute.xlu1 %1645 }
 0x468   : > { %v1294_v49 = vpop.xlane.xlu0 %1293  ;;  %v1660_v8 = vmul.f32 %v1656_v1, %v1646_v61 }
 0x469   : > { %v1314_v51 = vrot.slane %v1294_v49, %v2825_v58 }
 0x46b   : > { %v1317_v54 = vsel %vm1234_vm10, %v1314_v51, %v1316_v52  ;;  %v1653_v10 = vpop.permute.xlu1 %1652 }
 0x46c   : > { %v1319_v55 = vadd.f32 %v1317_v54, %v1282_v53  ;;  %v1632_v60 = vpop.permute.xlu0 %1631  ;;  %v1661_v16 = vmul.f32 %v1657_v9, %v1653_v10  ;;  %v2206_v9 = vld [vmem:[%s2984_s7] ss:$0 sm:$0xff] (%p369_p1) }
 0x46d   : > { %v1658_v63 = vmul.f32 %v1654_v59, %v1632_v60 }
 0x46e   : > { %1321 = vst.msk [vmem:[#allocation4] sm:$0xf] %vm1320_vm11, %v1319_v55 }
 0x475   : > { %v1677_v20 = vld [vmem:[#allocation4] sm:$0xf] (%p369_p1) }
 0x476   : > { %v1681_v22 = vrot.slane (%p369_p1), %v1677_v20, %v2835_v6  ;;  %v1695_v23 = vrot.slane (%p369_p1), %v1677_v20, %v2841_v12  ;;  %v1688_v25 = vrot.slane (%p369_p1), %v1677_v20, %v2833_v5  ;;  %v1702_v26 = vrot.slane (%p369_p1), %v1677_v20, %v2844_v15 }
 0x478   : > { %1683 = vbcast.lane.b32.xlu0 (%p369_p1), %v1681_v22, 256  ;;  %1697 = vbcast.lane.b32.xlu1 (%p369_p1), %v1695_v23, 256 }
 0x47c   : > { %1690 = vbcast.lane.b32.xlu0 (%p369_p1), %v1688_v25, 256  ;;  %1704 = vbcast.lane.b32.xlu1 (%p369_p1), %v1702_v26, 256 }
 0x4a3   : > { %v1470_v0 = vpop.f32.mrb[8].mxu1 }
 0x4a4   : > { %v1394_v2 = vpop.f32.mrb[8].mxu0  ;;  %v1663_v3 = vadd.f32 %v1659_v62, %v1470_v0  ;;  %v2338_v58 = vpop.f32.mrb[9].mxu1 }
 0x4a5   : > { %v1662_v4 = vadd.f32 %v1658_v63, %v1394_v2  ;;  %v2333_v7 = vpop.f32.mrb[9].mxu0 }
 0x4a6   : > { %1667 = vst.msk [vmem:[#allocation5 + $0x8] sm:$0xff] %vm901_vm6, %v1663_v3  ;;  %v2205_v7 = vld [vmem:[%s2983_s6] ss:$0 sm:$0xff] (%p369_p1) }
 0x4a7   : > { %1666 = vst.msk [vmem:[#allocation5] sm:$0xff] %vm901_vm6, %v1662_v4 }
 0x4a8   : > { %v1546_v11 = vpop.f32.mrb[10].mxu0  ;;  %1672 = sbr.rel (!%p369_p1) target bundleno = 1811 (0x713), region = 60 }
 0x4a9   : > { %v1664_v13 = vadd.f32 %v1660_v8, %v1546_v11  ;;  %v2343_v14 = vpop.f32.mrb[11].mxu0 }
 0x4ab   : > { %1668 = vst.msk [vmem:[#allocation5 + $0x10] sm:$0xff] %vm901_vm6, %v1664_v13  ;;  %v1622_v17 = vpop.f32.mrb[10].mxu1 }
 0x4ac   : > { %v1665_v18 = vadd.f32 %v1661_v16, %v1622_v17  ;;  %v2348_v19 = vpop.f32.mrb[11].mxu1 }
 0x4ad   : > { %v1674_v35 = vld [vmem:[#allocation5 + $0x8] sm:$0xff] (%p369_p1) }
 0x4ae   : > { %1669 = vst.msk [vmem:[#allocation5 + $0x18] sm:$0xff] %vm901_vm6, %v1665_v18  ;;  %v1673_v15 = vld [vmem:[#allocation5] sm:$0xff] (%p369_p1) }
 0x4b2   : > { %v1675_v31 = vld [vmem:[#allocation5 + $0x10] sm:$0xff] }
 0x4b5   : > { %v1676_v38 = vld [vmem:[#allocation5 + $0x18] sm:$0xff] }
 0x4ea   : > { %v1684_v6 = vpop.permute.xlu0 %1683  ;;  %v1698_v12 = vpop.permute.xlu1 %1697 }
 0x4eb   : > { %2473 = vrcp.f32 %v1684_v6 }
 0x4ec   : > { %2475 = vrcp.f32 %v1698_v12 }
 0x4ee   : > { %v1691_v29 = vpop.permute.xlu0 %1690  ;;  %v1705_v5 = vpop.permute.xlu1 %1704 }
 0x4ef   : > { %2477 = vrcp.f32 %v1691_v29 }
 0x4f0   : > { %2479 = vrcp.f32 %v1705_v5 }
 0x4f5   : > { %v2474_v30 = vpop.eup %2473 }
 0x4f6   : > { %v2476_v32 = vpop.eup %2475  ;;  %v1707_v33 = vmul.f32 %v2474_v30, %v1673_v15 }
 0x4f7   : > { %v1711_v36 = vmul.f32 %v2476_v32, %v1675_v31 }
 0x4f8   : > { %2352 = vmatmul.mubr.msk.f32.vlgmr.msra.gmra.mrb[0].mxu0 %vm901_vm6, %v1707_v33 }
 0x4f9   : > { %v2478_v37 = vpop.eup %2477  ;;  %2360 = vmatpush3.msra.mxu0 %v1716_v34  ;;  %2361 = vmatprep.mubr.msk.f32.mxu0 %vm2585_vm12, %v2584_v24 }
 0x4fa   : > { %v2480_v39 = vpop.eup %2479  ;;  %v1709_v42 = vmul.f32 %v2478_v37, %v1674_v35 }
 0x4fb   : > { %v1713_v40 = vmul.f32 %v2480_v39, %v1676_v38 }
 0x4fc   : > { %2357 = vmatmul.mubr.msk.f32.vlgmr.msra.gmra.mrb[0].mxu1 %vm901_vm6, %v1709_v42  ;;  %2362 = vmatmul.mubr.msk.f32.vlgmr.msra.gmra.mrb[2].mxu0 %vm901_vm6, %v1711_v36 }
 0x4fd   : > { %2365 = vmatpush3.msra.mxu1 %v1717_v43  ;;  %2366 = vmatprep.mubr.msk.f32.mxu1 %vm2585_vm12, %v2584_v24 }
 0x500   : > { %2367 = vmatmul.mubr.msk.f32.vlgmr.msra.gmra.mrb[2].mxu1 %vm901_vm6, %v1713_v40 }
 0x5cb   : > { %v1787_v41 = vpop.f32.mrb[0].mxu0 }
 0x5cc   : > { %v2353_v44 = vpop.f32.mrb[1].mxu0  ;;  %v2010_v28 = vsel %vm698_vm4, %v1787_v41, 0.0 }
 0x5cf   : > { %v1860_v45 = vpop.f32.mrb[0].mxu1  ;;  %v1933_v46 = vpop.f32.mrb[2].mxu0 }
 0x5d0   : > { %v2011_v47 = vsel %vm698_vm4, %v1860_v45, 0.0  ;;  %v2358_v48 = vpop.f32.mrb[1].mxu1  ;;  %v2363_v49 = vpop.f32.mrb[3].mxu0  ;;  %v2013_v51 = vsel %vm698_vm4, %v1933_v46, 0.0 }
 0x5d1   : > { %v2012_v50 = vadd.f32 %v2011_v47, %v2010_v28 }
 0x5d3   : > { %v2014_v52 = vadd.f32 %v2013_v51, %v2012_v50  ;;  %v2006_v53 = vpop.f32.mrb[2].mxu1 }
 0x5d4   : > { %v2015_v54 = vsel %vm698_vm4, %v2006_v53, 0.0  ;;  %v2368_v55 = vpop.f32.mrb[3].mxu1 }
 0x5d5   : > { %v2016_v57 = vadd.f32 %v2015_v54, %v2014_v52 }
 0x5d7   : > { %v2018_v59 = vadd.f32 %v2017_v56, %v2016_v57 }
 0x5d9   : > { %v2019_v60 = vsel %vm698_vm4, %v2018_v59, 0.0 }
 0x5da   : > { %2020 = vadd.xlane.f32.xlu0 %v2019_v60 }
 0x667   : > { %v2021_v61 = vpop.xlane.xlu0 %2020 }
 0x668   : > { %v2023_v62 = vmul.f32 0.03125, %v2021_v61 }
 0x66a   : > { %v2024_v63 = vsub.f32 %v2018_v59, %v2023_v62 }
 0x66c   : > { %v2025_v0 = vmul.f32 %v2024_v63, %v2024_v63 }
 0x66e   : > { %v2026_v1 = vsel %vm698_vm4, %v2025_v0, 0.0 }
 0x66f   : > { %2027 = vadd.xlane.f32.xlu1 %v2026_v1 }
 0x6fc   : > { %v2028_v2 = vpop.xlane.xlu1 %2027 }
 0x6fd   : > { %v2029_v3 = vmul.f32 0.03125, %v2028_v2 }
 0x6ff   : > { %v2030_v58 = vadd.f32 1e-06, %v2029_v3 }
 0x701   : > { %2481 = vrsqrt.f32 %v2030_v58 }
 0x70b   : > { %v2482_v4 = vpop.eup %2481 }
 0x70c   : > { %v2032_v8 = vmul.f32 %v2482_v4, %v2024_v63 }
 0x70e   : > { %v2040_v10 = vmul.f32 %v2205_v7, %v2032_v8 }
 0x710   : > { %v2048_v11 = vadd.f32 %v2206_v9, %v2040_v10 }
 0x712   : > { %2049 = vst.msk [vmem:[%s348_s21] sm:$0xff] %vm698_vm4, %v2048_v11 }
 0x713 PF: > { %s2208_s16 = sshll.u32 %s2565_s9, 7  ;;  %s2064_s22 = sshll.u32 %s348_s21, 4  ;;  %s2065_s22 = int_to_ptr.vmem [resolvable:$true] %s2064_s22 }
 0x714   : > { %s2926_s26 = scalar_lea.hbm %s2985_s8, %s2208_s16  ;;  %s3001_s30 = sand.u32 1, %s2553_s28  }
 0x715   : > { %s2051_s14 = scalar_lea.sflag [#allocation7], %s3001_s30  ;;  %s2483_s20 = scalar_lea.vmem %s2065_s22, 128 }
 0x716   : > { %p2484_p2 = scmp.ne.s32.totalorder %s2065_s22, %s2483_s20  ;;  %s2586_s24 = smov [#allocation6]  }
 0x717   : > { %s2487_s13 = sshll.u32 %s2586_s24, 4  ;;  %s2488_s13 = int_to_ptr.vmem [resolvable:$false] %s2487_s13 }
 0x718   : > { %p2485_p4 = pnand %p2484_p2, %p2681_p3  ;;  %s2489_s29 = scalar_lea.vmem %s2488_s13, 256 }
 0x719   : > { %p2490_p6 = scmp.lt.s32.totalorder %s2065_s22, %s2488_s13  ;;  %p2491_p7 = scmp.lt.s32.totalorder %s2489_s29, %s2483_s20 }
 0x71a   : > { %p2486_p5 = pneg %p2485_p4 }
 0x71b   : > { %p2492_p8 = por %p2491_p7, %p2490_p6 }
 0x71d   : > { %p2493_p10 = pnand %p2492_p8, %p2486_p5 }
 0x71f   : > { %2496 = shalt.err (!%p2493_p10)
}
 0x720   : > { %s2497_s9 = scalar_lea.hbm %s2926_s26, 128  ;;  %s2501_s10 = scalar_lea.hbm %s2985_s8, 256 }
 0x721   : > { %p2498_p11 = scmp.ne.s32.totalorder %s2926_s26, %s2497_s9  ;;  %p2502_p0 = scmp.lt.u32.totalorder %s2926_s26, %s2985_s8 }
 0x722   : > { %p2503_p1 = scmp.lt.u32.totalorder %s2501_s10, %s2497_s9  ;;  %p2505_p4 = scmp.lt.u32.totalorder %s2497_s9, %s2926_s26 }
 0x723   : > { %p2499_p12 = pnand %p2498_p11, %p2681_p3 }
 0x724   : > { %p2504_p2 = por %p2503_p1, %p2502_p0 }
 0x725   : > { %p2500_p13 = pneg %p2499_p12 }
 0x726   : > { %p2506_p5 = por %p2505_p4, %p2504_p2 }
 0x728   : > { %p2507_p6 = pnand %p2506_p5, %p2500_p13 }
 0x72a   : > { %2510 = shalt.err (!%p2507_p6)
}
 0x72b   : > { %2385 = dma.vmem_to_hbm [thread:$0]  (%p2681_p3), %s2065_s22, 128, %s2926_s26, %s2051_s14  }
 0x72c PF: > { %p2391_p7 = scmp.ge.s32.totalorder %s2577_s12, 2  ;;  %s2076_s16 = sand.u32 1, %s2549_s27  }
 0x72d   : > { %s2077_s18 = scalar_lea.sflag [#allocation7], %s2076_s16 }
 0x72e   : > { %p2388_p8 = pnand %p2391_p7, %p2691_p9 }
 0x730   : > { %2544 = dma.done.wait (!%p2388_p8), %s2077_s18, 128  }
 0x731   : > { %2546 = vsyncadd (!%p2388_p8), %s2077_s18, 4294967168  ;;  %s21_s12 = sadd.s32 1, %s2577_s12   ;;  %s3003_s25 = sld [smem:[#allocation9_spill]] }
 0x732   : > { %p18_p10 = scmp.ge.s32.totalorder %s21_s12, 6   ;;  %s3004_s29 = sld [smem:[#allocation15_spill]] }
 0x733   : > { %s3005_s30 = sld [smem:[#allocation10_spill]]  ;;  %s3006_s9 = sld [smem:[#allocation11_spill]] }
 0x734   : > { %s3007_s10 = sld [smem:[#allocation12_spill]]  ;;  %s3008_s11 = sld [smem:[#allocation13_spill]] }
 0x735   : > { %s3009_s27 = smov %s2553_s28  ;;  %20 = sbr.rel (!%p18_p10) target bundleno = 5 (0x5), region = 101 }
 0x737   : > { %s3010_s28 = smov %s3003_s25 }
 0x73c   :  { %2082 = vsyncpa [#allocation7], 1 }
 0x73d   :  { %2084 = vsyncpa [#allocation7 + $0x1], 1 }

</bundles_post_ra>
